<compile_context>
chip_gen: v6e
topology: v6e:2x2x1
jax: 0.10.0
libtpu: 0.0.40
codegen_flags: <defaults>
</compile_context>

<pallas_src>
import math
from functools import partial

import jax
import jax.numpy as jnp
from jax import lax
from jax.experimental import pallas as pl
from jax.experimental.pallas import tpu as pltpu


# --------------------------------------------------------------------------- #
# Kernel                                                                      #
# --------------------------------------------------------------------------- #
def _sdpa_kernel(*refs, scale, mask_mode, mxu_dtype, store_attn):
    """One grid step = (batch block, head block, query block).

    Ref order: q, k, v, [mask], out, [attn]
      q    : (bb, hb, tq, Dk)    k : (bb, hb, S, Dk)    v : (bb, hb, S, Dv)
      mask : (mbb, mhb, tq, S)   out : (bb, hb, tq, Dv) attn: (bb, hb, tq, S)
    """
    q_ref, k_ref, v_ref = refs[0], refs[1], refs[2]
    i = 3
    m_ref = None
    if mask_mode == "external":
        m_ref = refs[i]
        i += 1
    o_ref = refs[i]
    i += 1
    a_ref = refs[i] if store_attn else None

    bb, hb, tq, Dk = q_ref.shape
    S = k_ref.shape[2]
    Dv = v_ref.shape[3]
    G = bb * hb  # merged batch*head dim for the batched matmuls

    # Fold 1/temperature into q (O(tq*Dk) instead of O(tq*S)), then feed the MXU
    # bf16 operands with f32 accumulation.
    q = (q_ref[...] * scale).astype(mxu_dtype).reshape(G, tq, Dk)
    k = k_ref[...].astype(mxu_dtype).reshape(G, S, Dk)
    v = v_ref[...].astype(mxu_dtype).reshape(G, S, Dv)

    # q @ k^T, no explicit transpose: contract the Dk dims, batch over G.
    s = lax.dot_general(
        q, k,
        dimension_numbers=(((2,), (2,)), ((0,), (0,))),
        preferred_element_type=jnp.float32,
    )  # (G, tq, S) f32

    if mask_mode == "external":
        # PyTorch semantics: positions where the mask is 0 are masked out.
        s4 = s.reshape(bb, hb, tq, S)
        s4 = jnp.where(m_ref[...] == 0, -1e9, s4)  # (mbb,mhb,tq,S) broadcasts
        s = s4.reshape(G, tq, S)
    elif mask_mode == "diag":
        # SAITS diagonal self-mask, generated in-kernel (no HBM mask traffic).
        q_start = pl.program_id(2) * tq
        rows = lax.broadcasted_iota(jnp.int32, (tq, S), 0) + q_start
        cols = lax.broadcasted_iota(jnp.int32, (tq, S), 1)
        s = jnp.where(rows == cols, -1e9, s)

    # Numerically-stable softmax along the key axis, kept in f32.
    s_max = jnp.max(s, axis=-1, keepdims=True)
    p = jnp.exp(s - s_max)
    denom = jnp.sum(p, axis=-1, keepdims=True)
    # EUP approximate reciprocal + one Newton step -> ~f32 accuracy, no divide chain.
    r = pl.reciprocal(denom, approx=True)
    r = r * (2.0 - denom * r)
    attn_f32 = p * r                          # (G, tq, S) f32
    attn_lp = attn_f32.astype(mxu_dtype)      # computed once, reused below

    # attn @ v: contract the key axis, batch over G.
    out = lax.dot_general(
        attn_lp, v,
        dimension_numbers=(((2,), (1,)), ((0,), (0,))),
        preferred_element_type=jnp.float32,
    )  # (G, tq, Dv) f32

    o_ref[...] = out.reshape(bb, hb, tq, Dv).astype(o_ref.dtype)
    if store_attn:
        if a_ref.dtype == attn_lp.dtype:
            a_ref[...] = attn_lp.reshape(bb, hb, tq, S)
        else:
            a_ref[...] = attn_f32.reshape(bb, hb, tq, S).astype(a_ref.dtype)


# --------------------------------------------------------------------------- #
# Tiling helpers                                                              #
# --------------------------------------------------------------------------- #
def _vmem_capacity_bytes():
    try:
        info = pltpu.get_tpu_info()
        cap = getattr(info, "vmem_capacity_bytes", None)
        if cap:
            return int(cap)
    except Exception:
        pass
    return 64 * 1024 * 1024  # conservative (v7x per-TC VMEM)


def _divisors_desc(n):
    return [d for d in range(n, 0, -1) if n % d == 0]


def _choose_tiling(B, H, S, Dk, Dv, in_bytes, out_bytes, attn_bytes,
                   mask_bytes, mask_b_varies, mask_h_varies, store_attn, budget):
    """Pick (bb, hb, tq) so the double-buffered working set fits `budget`."""
    tq = S if S <= 128 else 128

    def est(bb, hb):
        e = 2 * bb * hb * (tq * Dk + S * Dk + S * Dv) * in_bytes   # q, k, v tiles
        e += 2 * bb * hb * tq * Dv * out_bytes                      # out tile
        if store_attn:
            e += 2 * bb * hb * tq * S * attn_bytes                  # attn tile
        if mask_bytes:
            mbb = bb if mask_b_varies else 1
            mhb = hb if mask_h_varies else 1
            e += 2 * mbb * mhb * tq * S * mask_bytes                # mask tile
        e += 4 * bb * hb * tq * S * 4                               # f32 temporaries
        return e

    # Head blocking: only shrink below full-H residency if it does not fit.
    hb = 1
    for d in _divisors_desc(H):
        if est(1, d) <= budget:
            hb = d
            break

    # Batch blocking: for small S, pack several batch elements per grid step to
    # amortize per-step grid overhead and pipeline ramp.
    bb = 1
    if S <= 128 and hb == H:
        for d in _divisors_desc(B):
            if est(d, hb) <= budget:
                bb = d
                break

    return bb, hb, tq


# --------------------------------------------------------------------------- #
# Wrapper                                                                     #
# --------------------------------------------------------------------------- #
def attention_operator(q, k, v, attn_mask=None, *, temperature=None,
                       diagonal_mask=False, return_attn=True,
                       attn_dtype=None, mxu_dtype=jnp.bfloat16):
    """Pallas scaled-dot-product attention (ScaledDotProductAttention.forward).

    q, k: (B, H, S, Dk); v: (B, H, S, Dv).
    attn_mask: optional mask broadcastable to (B, H, S, S); positions where it
        is 0 are masked (PyTorch masked_fill semantics). Shapes (S,S), (B,S,S),
        (1,1,S,S), (B,1,S,S), (B,H,S,S) are accepted without materializing the
        full broadcast in HBM.
    diagonal_mask: if True (and attn_mask is None), apply the SAITS diagonal
        self-mask, generated in-kernel (no mask DMA at all).
    temperature: scaling temperature (default sqrt(Dk)).
    return_attn: if False, skip the (B,H,S,S) attention-map output entirely.
    attn_dtype: dtype of the returned attention map (default q.dtype; bf16
        halves the dominant HBM write).
    mxu_dtype: operand dtype for the two matmuls (f32 accumulation regardless).

    Returns (output (B,H,S,Dv), attn (B,H,S,S)) or just output if not return_attn.
    """
    B, H, S, Dk = q.shape
    Dv = v.shape[-1]
    out_dtype = q.dtype
    attn_dtype = jnp.dtype(out_dtype if attn_dtype is None else attn_dtype)
    scale = 1.0 / (float(temperature) if temperature is not None else math.sqrt(Dk))

    if diagonal_mask and attn_mask is not None:
        raise ValueError("pass either attn_mask or diagonal_mask, not both")
    mask_mode = "diag" if diagonal_mask else ("external" if attn_mask is not None else "none")

    # ---- mask normalization (no f32 cast, no broadcast materialization) ---- #
    if mask_mode == "external":
        m = attn_mask
        if m.ndim == 2:            # (S, S)
            m = m[None, None]
        elif m.ndim == 3:          # (B or 1, S, S) -> MHA's unsqueeze(1)
            m = m[:, None]
        if m.dtype == jnp.bool_:
            m = m.astype(jnp.int8)  # i1 is awkward on TPU; i8 keeps it tiny
        MB, MH = int(m.shape[0]), int(m.shape[1])
        assert m.shape[2] == S and m.shape[3] == S, "mask must cover (S, S)"
        assert MB in (1, B) and MH in (1, H), "mask must be broadcastable to (B,H,S,S)"
        mask_bytes = jnp.dtype(m.dtype).itemsize
    else:
        m, MB, MH, mask_bytes = None, 1, 1, 0

    # ---- generation-aware tiling ---- #
    budget = int(0.70 * _vmem_capacity_bytes())   # ~45 MiB on v7x, ~90 MiB on v5e/v6e
    bb, hb, tq = _choose_tiling(
        B, H, S, Dk, Dv,
        in_bytes=jnp.dtype(q.dtype).itemsize,
        out_bytes=jnp.dtype(out_dtype).itemsize,
        attn_bytes=attn_dtype.itemsize,
        mask_bytes=mask_bytes,
        mask_b_varies=(MB > 1), mask_h_varies=(MH > 1),
        store_attn=return_attn, budget=budget)

    nb, nh, nq = B // bb, H // hb, pl.cdiv(S, tq)
    grid = (nb, nh, nq)

    in_specs = [
        pl.BlockSpec((bb, hb, tq, Dk), lambda b, h, qi: (b, h, qi, 0)),  # q tile
        pl.BlockSpec((bb, hb, S, Dk), lambda b, h, qi: (b, h, 0, 0)),    # k (reused across qi)
        pl.BlockSpec((bb, hb, S, Dv), lambda b, h, qi: (b, h, 0, 0)),    # v (reused across qi)
    ]
    args = [q, k, v]

    if mask_mode == "external":
        mbb = bb if MB > 1 else 1
        mhb = hb if MH > 1 else 1

        def mask_index_map(b, h, qi, _vb=(MB > 1), _vh=(MH > 1)):
            return (b if _vb else 0, h if _vh else 0, qi, 0)

        in_specs.append(pl.BlockSpec((mbb, mhb, tq, S), mask_index_map))
        args.append(m)

    out_spec = pl.BlockSpec((bb, hb, tq, Dv), lambda b, h, qi: (b, h, qi, 0))
    out_struct = jax.ShapeDtypeStruct((B, H, S, Dv), out_dtype)
    if return_attn:
        attn_spec = pl.BlockSpec((bb, hb, tq, S), lambda b, h, qi: (b, h, qi, 0))
        out_specs = [out_spec, attn_spec]
        out_shape = (out_struct, jax.ShapeDtypeStruct((B, H, S, S), attn_dtype))
    else:
        out_specs = out_spec
        out_shape = out_struct

    kernel = partial(_sdpa_kernel, scale=scale, mask_mode=mask_mode,
                     mxu_dtype=mxu_dtype, store_attn=return_attn)

    result = pl.pallas_call(
        kernel,
        out_shape=out_shape,
        grid_spec=pltpu.PrefetchScalarGridSpec(
            num_scalar_prefetch=0,
            grid=grid,
            in_specs=in_specs,
            out_specs=out_specs,
        ),
        compiler_params=pltpu.CompilerParams(
            dimension_semantics=("parallel", "parallel", "parallel"),
            vmem_limit_bytes=max(budget, 32 * 1024 * 1024),
        ),
    )(*args)

    if return_attn:
        out, attn = result
        return out, attn
    return result


# --------------------------------------------------------------------------- #
# Reference (mirrors the kernel's bf16-operand / f32-accumulate policy)       #
# --------------------------------------------------------------------------- #
def _reference(q, k, v, attn_mask=None, temperature=None, diagonal_mask=False,
               mxu_dtype=jnp.bfloat16):
    S, Dk = q.shape[2], q.shape[3]
    scale = 1.0 / (float(temperature) if temperature is not None else math.sqrt(Dk))
    qs = (q * scale).astype(mxu_dtype)
    ks = k.astype(mxu_dtype)
    s = jnp.einsum("bhqd,bhkd->bhqk", qs, ks,
                   preferred_element_type=jnp.float32)
    if diagonal_mask:
        s = jnp.where(jnp.eye(S, dtype=bool), -1e9, s)
    elif attn_mask is not None:
        m = attn_mask
        if m.ndim == 2:
            m = m[None, None]
        elif m.ndim == 3:
            m = m[:, None]
        s = jnp.where(m == 0, -1e9, s)
    attn = jax.nn.softmax(s, axis=-1)
    out = jnp.einsum("bhqk,bhkd->bhqd", attn.astype(mxu_dtype), v.astype(mxu_dtype),
                     preferred_element_type=jnp.float32)
    return out.astype(q.dtype), attn.astype(q.dtype)


# --------------------------------------------------------------------------- #
# Self-test                                                                   #
# --------------------------------------------------------------------------- #
if __name__ == "__main__":
    # Small SAITS-like config: batch=2, n_heads=2, n_steps=8, d_k=d_v=32.
    B, H, S, D = 2, 2, 8, 32
    key = jax.random.PRNGKey(0)
    kq, kk, kv = jax.random.split(key, 3)
    q = jax.random.normal(kq, (B, H, S, D), dtype=jnp.float32)
    k = jax.random.normal(kk, (B, H, S, D), dtype=jnp.float32)
    v = jax.random.normal(kv, (B, H, S, D), dtype=jnp.float32)

    temperature = math.sqrt(D)  # BackboneSAITS: ScaledDotProductAttention(d_k ** 0.5, ...)

    # 1) SAITS path: diagonal self-mask generated in-kernel (no mask DMA).
    out_d, attn_d = attention_operator(q, k, v, temperature=temperature,
                                       diagonal_mask=True)
    # 2) External 0/1 mask (PyTorch masked_fill semantics), natural (1,1,S,S) shape.
    mask01 = (1.0 - jnp.eye(S, dtype=jnp.float32))[None, None]
    out_m, attn_m = attention_operator(q, k, v, mask01, temperature=temperature)
    # 3) No mask.
    out_n, attn_n = attention_operator(q, k, v, temperature=temperature)
    # 4) Output-only variant (drops the S^2 attn-map HBM write).
    out_only = attention_operator(q, k, v, temperature=temperature,
                                  diagonal_mask=True, return_attn=False)
    # 5) bf16 attention map (halves the dominant HBM write).
    _, attn_bf16 = attention_operator(q, k, v, temperature=temperature,
                                      diagonal_mask=True,
                                      attn_dtype=jnp.bfloat16)
    jax.block_until_ready((out_d, attn_d, out_m, attn_m, out_n, attn_n,
                           out_only, attn_bf16))

    ref_out_d, ref_attn_d = _reference(q, k, v, temperature=temperature,
                                       diagonal_mask=True)
    ref_out_m, ref_attn_m = _reference(q, k, v, mask01, temperature=temperature)
    ref_out_n, ref_attn_n = _reference(q, k, v, temperature=temperature)

    tol = dict(atol=2e-3, rtol=2e-3)
    assert jnp.allclose(out_d, ref_out_d, **tol)
    assert jnp.allclose(attn_d, ref_attn_d, **tol)
    assert jnp.allclose(out_m, ref_out_m, **tol)
    assert jnp.allclose(attn_m, ref_attn_m, **tol)
    assert jnp.allclose(out_n, ref_out_n, **tol)
    assert jnp.allclose(attn_n, ref_attn_n, **tol)
    assert jnp.allclose(out_only, ref_out_d, **tol)
    assert jnp.allclose(attn_bf16.astype(jnp.float32), ref_attn_d, atol=1e-2, rtol=1e-2)
    # Softmax rows must sum to 1 and diagonal must be masked out.
    assert jnp.allclose(jnp.sum(attn_d, axis=-1), 1.0, atol=1e-4)
    assert jnp.max(jnp.abs(jnp.diagonal(attn_d, axis1=-2, axis2=-1))) < 1e-6

    print("KERNEL_OK")
</pallas_src>

<mosaic_0001>
module attributes {stable_mosaic.version = 11 : i64} {
  func.func @_sdpa_kernel(%arg0: i32, %arg1: i32, %arg2: i32, %arg3: memref<2x2x8x32xf32, #tpu.memory_space<vmem>>, %arg4: memref<2x2x8x32xf32, #tpu.memory_space<vmem>>, %arg5: memref<2x2x8x32xf32, #tpu.memory_space<vmem>>, %arg6: memref<2x2x8x32xf32, #tpu.memory_space<vmem>>, %arg7: memref<2x2x8x8xf32, #tpu.memory_space<vmem>>) attributes {dimension_semantics = [#tpu.dimension_semantics<parallel>, #tpu.dimension_semantics<parallel>, #tpu.dimension_semantics<parallel>], iteration_bounds = array<i64: 1, 1, 1>, scalar_prefetch = 0 : i64, scratch_operands = 0 : i64, tpu.core_type = #tpu.core_type<tc>, window_params = [{transform_indices = @transform_0, window_bounds = array<i64: 2, 2, 8, 32>}, {transform_indices = @transform_1, window_bounds = array<i64: 2, 2, 8, 32>}, {transform_indices = @transform_2, window_bounds = array<i64: 2, 2, 8, 32>}, {transform_indices = @transform_3, window_bounds = array<i64: 2, 2, 8, 32>}, {transform_indices = @transform_4, window_bounds = array<i64: 2, 2, 8, 8>}]} {
    %c0 = arith.constant 0 : index
    %c0_0 = arith.constant 0 : index
    %c0_1 = arith.constant 0 : index
    %c0_2 = arith.constant 0 : index
    %0 = vector.load %arg3[%c0, %c0_0, %c0_1, %c0_2] : memref<2x2x8x32xf32, #tpu.memory_space<vmem>>, vector<2x2x8x32xf32>
    %cst = arith.constant 0.176776692 : f32
    %1 = vector.broadcast %cst : f32 to vector<2x2x8x32xf32>
    %2 = arith.mulf %0, %1 : vector<2x2x8x32xf32>
    %3 = arith.truncf %2 : vector<2x2x8x32xf32> to vector<2x2x8x32xbf16>
    %4 = vector.shape_cast %3 : vector<2x2x8x32xbf16> to vector<4x8x32xbf16>
    %c0_3 = arith.constant 0 : index
    %c0_4 = arith.constant 0 : index
    %c0_5 = arith.constant 0 : index
    %c0_6 = arith.constant 0 : index
    %5 = vector.load %arg4[%c0_3, %c0_4, %c0_5, %c0_6] : memref<2x2x8x32xf32, #tpu.memory_space<vmem>>, vector<2x2x8x32xf32>
    %6 = arith.truncf %5 : vector<2x2x8x32xf32> to vector<2x2x8x32xbf16>
    %7 = vector.shape_cast %6 : vector<2x2x8x32xbf16> to vector<4x8x32xbf16>
    %c0_7 = arith.constant 0 : index
    %c0_8 = arith.constant 0 : index
    %c0_9 = arith.constant 0 : index
    %c0_10 = arith.constant 0 : index
    %8 = vector.load %arg5[%c0_7, %c0_8, %c0_9, %c0_10] : memref<2x2x8x32xf32, #tpu.memory_space<vmem>>, vector<2x2x8x32xf32>
    %9 = arith.truncf %8 : vector<2x2x8x32xf32> to vector<2x2x8x32xbf16>
    %10 = vector.shape_cast %9 : vector<2x2x8x32xbf16> to vector<4x8x32xbf16>
    %cst_11 = arith.constant dense<0.000000e+00> : vector<4x8x8xf32>
    %11 = tpu.matmul %4, %7, %cst_11 {dimension_numbers = #tpu.dot_dimension_numbers<[2], [2], [1], [1], [0, 0, 0, 1, 1, 1], [0], [0]>} : vector<4x8x32xbf16>, vector<4x8x32xbf16>, vector<4x8x8xf32> -> vector<4x8x8xf32>
    %c8_i32 = arith.constant 8 : i32
    %12 = arith.muli %arg2, %c8_i32 : i32
    %13 = tpu.iota {dimensions = array<i32: 0>} : vector<8x8xi32>
    %14 = vector.broadcast %12 : i32 to vector<8x8xi32>
    %15 = arith.addi %13, %14 : vector<8x8xi32>
    %16 = tpu.iota {dimensions = array<i32: 1>} : vector<8x8xi32>
    %17 = arith.cmpi eq, %15, %16 : vector<8x8xi32>
    %cst_12 = arith.constant -1.000000e+09 : f32
    %18 = vector.shape_cast %17 : vector<8x8xi1> to vector<1x8x8xi1>
    %19 = vector.broadcast %18 : vector<1x8x8xi1> to vector<4x8x8xi1>
    %20 = vector.broadcast %cst_12 : f32 to vector<4x8x8xf32>
    %21 = arith.select %19, %20, %11 : vector<4x8x8xi1>, vector<4x8x8xf32>
    %cst_13 = arith.constant dense<0xFF800000> : vector<4x8xf32>
    %22 = vector.multi_reduction <maximumf>, %21, %cst_13 [2] : vector<4x8x8xf32> to vector<4x8xf32>
    %23 = vector.shape_cast %22 : vector<4x8xf32> to vector<4x8x1xf32>
    %24 = vector.broadcast %23 : vector<4x8x1xf32> to vector<4x8x8xf32>
    %25 = arith.subf %21, %24 : vector<4x8x8xf32>
    %26 = math.exp %25 : vector<4x8x8xf32>
    %cst_14 = arith.constant dense<0.000000e+00> : vector<4x8xf32>
    %27 = vector.multi_reduction <add>, %26, %cst_14 [2] : vector<4x8x8xf32> to vector<4x8xf32>
    %28 = vector.shape_cast %27 : vector<4x8xf32> to vector<4x8x1xf32>
    %29 = tpu.reciprocal %28 {approx = true} : vector<4x8x1xf32> -> vector<4x8x1xf32>
    %30 = arith.mulf %28, %29 : vector<4x8x1xf32>
    %cst_15 = arith.constant 2.000000e+00 : f32
    %31 = vector.broadcast %cst_15 : f32 to vector<4x8x1xf32>
    %32 = arith.subf %31, %30 : vector<4x8x1xf32>
    %33 = arith.mulf %29, %32 : vector<4x8x1xf32>
    %34 = vector.broadcast %33 : vector<4x8x1xf32> to vector<4x8x8xf32>
    %35 = arith.mulf %26, %34 : vector<4x8x8xf32>
    %36 = arith.truncf %35 : vector<4x8x8xf32> to vector<4x8x8xbf16>
    %cst_16 = arith.constant dense<0.000000e+00> : vector<4x8x32xf32>
    %37 = tpu.matmul %36, %10, %cst_16 {dimension_numbers = #tpu.dot_dimension_numbers<[2], [1], [1], [2], [0, 0, 0, 1, 1, 2], [0], [0]>} : vector<4x8x8xbf16>, vector<4x8x32xbf16>, vector<4x8x32xf32> -> vector<4x8x32xf32>
    %38 = vector.shape_cast %37 : vector<4x8x32xf32> to vector<2x2x8x32xf32>
    %c0_17 = arith.constant 0 : index
    %c0_18 = arith.constant 0 : index
    %c0_19 = arith.constant 0 : index
    %c0_20 = arith.constant 0 : index
    %39 = vector.load %arg6[%c0_17, %c0_18, %c0_19, %c0_20] : memref<2x2x8x32xf32, #tpu.memory_space<vmem>>, vector<2x2x8x32xf32>
    tpu.vector_store %arg6[%c0_17, %c0_18, %c0_19, %c0_20], %38 {strides = array<i32>} : memref<2x2x8x32xf32, #tpu.memory_space<vmem>>, vector<2x2x8x32xf32>,
    %40 = vector.shape_cast %35 : vector<4x8x8xf32> to vector<2x2x8x8xf32>
    %c0_21 = arith.constant 0 : index
    %c0_22 = arith.constant 0 : index
    %c0_23 = arith.constant 0 : index
    %c0_24 = arith.constant 0 : index
    %41 = vector.load %arg7[%c0_21, %c0_22, %c0_23, %c0_24] : memref<2x2x8x8xf32, #tpu.memory_space<vmem>>, vector<2x2x8x8xf32>
    tpu.vector_store %arg7[%c0_21, %c0_22, %c0_23, %c0_24], %40 {strides = array<i32>} : memref<2x2x8x8xf32, #tpu.memory_space<vmem>>, vector<2x2x8x8xf32>,
    return
  }
  func.func @transform_0(%arg0: i32, %arg1: i32, %arg2: i32) -> (i32, i32, i32, i32) {
    %c0_i32 = arith.constant 0 : i32
    %c0_i32_0 = arith.constant 0 : i32
    return %arg0, %arg1, %arg2, %c0_i32 : i32, i32, i32, i32
  }
  func.func @transform_1(%arg0: i32, %arg1: i32, %arg2: i32) -> (i32, i32, i32, i32) {
    %c0_i32 = arith.constant 0 : i32
    %c0_i32_0 = arith.constant 0 : i32
    %c0_i32_1 = arith.constant 0 : i32
    return %arg0, %arg1, %c0_i32, %c0_i32_0 : i32, i32, i32, i32
  }
  func.func @transform_2(%arg0: i32, %arg1: i32, %arg2: i32) -> (i32, i32, i32, i32) {
    %c0_i32 = arith.constant 0 : i32
    %c0_i32_0 = arith.constant 0 : i32
    %c0_i32_1 = arith.constant 0 : i32
    return %arg0, %arg1, %c0_i32, %c0_i32_0 : i32, i32, i32, i32
  }
  func.func @transform_3(%arg0: i32, %arg1: i32, %arg2: i32) -> (i32, i32, i32, i32) {
    %c0_i32 = arith.constant 0 : i32
    %c0_i32_0 = arith.constant 0 : i32
    return %arg0, %arg1, %arg2, %c0_i32 : i32, i32, i32, i32
  }
  func.func @transform_4(%arg0: i32, %arg1: i32, %arg2: i32) -> (i32, i32, i32, i32) {
    %c0_i32 = arith.constant 0 : i32
    %c0_i32_0 = arith.constant 0 : i32
    return %arg0, %arg1, %arg2, %c0_i32 : i32, i32, i32, i32
  }
}

</mosaic_0001>

<bundles_post_ra>
// kernel: tpu_custom_call.1
= control target key start
LH: loop header
LB: loop body
LE: loop exit
PB: predicated region body
PF: predicated region fallthrough
CT: control target
= control target key end

     0   :  { %10 = vsyncpa [#allocation3], 0  ;;  %s904_s0 = inlined_call_operand.hbm [shape: f32[2,2,8,32], index: 0, kind: input, shape index: {}]   ;;  %s905_s1 = inlined_call_operand.hbm [shape: f32[2,2,8,32], index: 1, kind: input, shape index: {}]   ;;  %s906_s2 = inlined_call_operand.hbm [shape: f32[2,2,8,32], index: 2, kind: input, shape index: {}]   ;;  %s907_s3 = inlined_call_operand.hbm [shape: f32[2,2,8,32], index: 3, kind: output, shape index: {0}]   ;;  %s908_s4 = inlined_call_operand.hbm [shape: f32[2,2,8,8], index: 4, kind: output, shape index: {1}]  }
   0x1   :  { %11 = vsyncpa [#allocation6], 0 }
   0x2   :  { %12 = vsyncpa [#allocation4], 0 }
   0x3   :  { %13 = vsyncpa [#allocation10], 0  ;;  %s780_s15 = smov [#allocation5]   ;;  %s781_s17 = smov [#allocation2]  }
   0x4   :  { %s31_s16 = sshll.u32 %s780_s15, 4  ;;  %s19_s18 = sshll.u32 %s781_s17, 4  ;;  %s32_s16 = int_to_ptr.vmem [resolvable:$true] %s31_s16  ;;  %s20_s18 = int_to_ptr.vmem [resolvable:$true] %s19_s18 }
   0x5   :  { %s680_s19 = scalar_lea.vmem %s32_s16, 512  ;;  %p685_p1 = scmp.lt.s32.totalorder %s32_s16, %s32_s16 }
   0x6   :  { %p681_p0 = scmp.ne.s32.totalorder %s32_s16, %s680_s19  ;;  %p686_p2 = scmp.lt.s32.totalorder %s680_s19, %s680_s19 }
   0x8   :  { %p687_p3 = por %p686_p2, %p685_p1 }
   0xa   :  { %p688_p4 = pnand %p687_p3, %p681_p0 }
   0xc   :  { %691 = shalt.err (!%p688_p4)
}
   0xd   :  { %s782_s20 = smov 128   ;;  %s783_s21 = smov 8  }
   0xe   :  { %37 = dma.hbm_to_vmem [thread:$0]  %s905_s1, 512, %s32_s16, [#allocation6], %s782_s20, %s782_s20, %s783_s21  }
   0xf   :  { %s700_s24 = scalar_lea.vmem %s20_s18, 512  ;;  %p705_p6 = scmp.lt.s32.totalorder %s20_s18, %s20_s18 }
  0x10   :  { %p701_p5 = scmp.ne.s32.totalorder %s20_s18, %s700_s24  ;;  %p706_p7 = scmp.lt.s32.totalorder %s700_s24, %s700_s24 }
  0x12   :  { %p707_p8 = por %p706_p7, %p705_p6 }
  0x14   :  { %p708_p9 = pnand %p707_p8, %p701_p5 }
  0x16   :  { %711 = shalt.err (!%p708_p9)
}
  0x17   :  { %25 = dma.hbm_to_vmem [thread:$0]  %s904_s0, 512, %s20_s18, [#allocation3], %s782_s20, %s782_s20, %s783_s21  }
  0x18   :  { %s784_s27 = smov [#allocation7]  }
  0x19   :  { %s43_s28 = sshll.u32 %s784_s27, 4  ;;  %s44_s28 = int_to_ptr.vmem [resolvable:$true] %s43_s28 }
  0x1a   :  { %s720_s29 = scalar_lea.vmem %s44_s28, 512  ;;  %p725_p11 = scmp.lt.s32.totalorder %s44_s28, %s44_s28 }
  0x1b   :  { %p721_p10 = scmp.ne.s32.totalorder %s44_s28, %s720_s29  ;;  %p726_p12 = scmp.lt.s32.totalorder %s720_s29, %s720_s29 }
  0x1d   :  { %p727_p13 = por %p726_p12, %p725_p11 }
  0x1f   :  { %p728_p0 = pnand %p727_p13, %p721_p10 }
  0x21   :  { %731 = shalt.err (!%p728_p0)
}
  0x22   :  { %49 = dma.hbm_to_vmem [thread:$0]  %s906_s2, 512, %s44_s28, [#allocation6], %s782_s20, %s782_s20, %s783_s21  }
  0x23   :  { %772 = dma.done.wait [#allocation3], 512  }
  0x24   :  { %773 = vsyncadd [#allocation3], 4294966784 }
  0x25   :  { %774 = dma.done.wait [#allocation6], 1024  }
  0x26   :  { %775 = vsyncadd [#allocation6], 4294966272  ;;  %v785_v0 = vmov 0.0   ;;  %vm786_vm0 = vmmov 0   ;;  %v72_v1 = vld [vmem:[#allocation5] sm:$0xff]  ;;  %vm88_vm1 = vcmask 261120   ;;  %v274_v25 = vlaneseq }
  0x27   :  { %599 = vmatprep.subr.bf16.mxu0 %v785_v0  ;;  %605 = vmatprep.subr.bf16.mxu1 %v785_v0  ;;  %v73_v2 = vld [vmem:[#allocation5 + $0x8] sm:$0xff]  ;;  %v60_v3 = vld [vmem:[#allocation2] sm:$0xff]  ;;  %v76_v4 = vpack.c.bf16 %v72_v1, %v72_v1  ;;  %v74_v7 = vld [vmem:[#allocation5 + $0x10] sm:$0xff]  ;;  %vm287_vm3 = vcmask 64512   ;;  %vm351_vm4 = vcmask 1043456   ;;  %s787_s0 = smov [#allocation9]  }
  0x28   :  { %601 = vmatprep.mubr.msk.bf16.mxu0 %vm786_vm0, %v785_v0  ;;  %607 = vmatprep.mubr.msk.bf16.mxu1 %vm786_vm0, %v785_v0  ;;  %v77_v5 = vpack.c.bf16 %v73_v2, %v73_v2  ;;  %v61_v6 = vld [vmem:[#allocation2 + $0x8] sm:$0xff]  ;;  %v75_v8 = vld [vmem:[#allocation5 + $0x18] sm:$0xff]  ;;  %v64_v11 = vmul.f32 0.17677669, %v60_v3  ;;  %v78_v13 = vpack.c.bf16 %v74_v7, %v74_v7  ;;  %v62_v17 = vld [vmem:[#allocation2 + $0x10] sm:$0xff]  ;;  %v275_v26 = vshrl.u32 %v274_v25, 7 }
  0x29   :  { %v93_v9 = vsel %vm88_vm1, %v76_v4, 0  ;;  %v65_v12 = vmul.f32 0.17677669, %v61_v6  ;;  %v79_v14 = vpack.c.bf16 %v75_v8, %v75_v8  ;;  %v63_v18 = vld [vmem:[#allocation2 + $0x18] sm:$0xff]  ;;  %v66_v21 = vmul.f32 0.17677669, %v62_v17 }
  0x2a   :  { %v139_v10 = vsel %vm88_vm1, %v77_v5, 0  ;;  %600 = vmatpush3.bf16.xpose.msra.mxu0 %v93_v9  ;;  %v68_v15 = vpack.c.bf16 %v64_v11, %v64_v11  ;;  %v185_v19 = vsel %vm88_vm1, %v78_v13, 0  ;;  %v67_v22 = vmul.f32 0.17677669, %v63_v18  ;;  %v80_v9 = vld [vmem:[#allocation7] sm:$0xff]  ;;  %s558_s2 = sshll.u32 %s787_s0, 4  ;;  %s559_s2 = int_to_ptr.vmem [resolvable:$true] %s558_s2 }
  0x2b   :  { %606 = vmatpush3.bf16.xpose.msra.mxu1 %v139_v10  ;;  %611 = vmatprep.subr.bf16.mxu0 %v785_v0  ;;  %v69_v16 = vpack.c.bf16 %v65_v12, %v65_v12  ;;  %v231_v20 = vsel %vm88_vm1, %v79_v14, 0  ;;  %v70_v23 = vpack.c.bf16 %v66_v21, %v66_v21  ;;  %v279_v27 = vand.u32 127, %v274_v25  ;;  %v81_v12 = vld [vmem:[#allocation7 + $0x8] sm:$0xff]  ;;  %v82_v21 = vld [vmem:[#allocation7 + $0x10] sm:$0xff]  ;;  %s732_s5 = scalar_lea.vmem %s559_s2, 512  ;;  %p737_p2 = scmp.lt.s32.totalorder %s559_s2, %s559_s2 }
  0x2c   :  { %617 = vmatprep.subr.bf16.mxu1 %v785_v0  ;;  %v71_v24 = vpack.c.bf16 %v67_v22, %v67_v22  ;;  %v84_v10 = vpack.c.bf16 %v80_v9, %v80_v9  ;;  %v85_v13 = vpack.c.bf16 %v81_v12, %v81_v12  ;;  %p733_p1 = scmp.ne.s32.totalorder %s559_s2, %s732_s5  ;;  %p738_p3 = scmp.lt.s32.totalorder %s732_s5, %s732_s5 }
  0x2d   :  { %vm280_vm2 = vcmp.eq.s32.totalorder %v275_v26, %v279_v27  ;;  %v83_v27 = vld [vmem:[#allocation7 + $0x18] sm:$0xff] }
  0x2e   :  { %v353_v11 = vsel %vm351_vm4, %v84_v10, 0  ;;  %v399_v14 = vsel %vm351_vm4, %v85_v13, 0  ;;  %p739_p4 = por %p738_p3, %p737_p2 }
  0x30   :  { %p740_p5 = pnand %p739_p4, %p733_p1 }
  0x31   :  { %602 = vmatmul.mubr.msk.bf16.vlgmr.msra.gmra.mxu0 %vm88_vm1, %v68_v15 }
  0x32   :  { %608 = vmatmul.mubr.msk.bf16.vlgmr.msra.gmra.mxu1 %vm88_vm1, %v69_v16  ;;  %612 = vmatpush3.bf16.xpose.msra.mxu0 %v185_v19 }
  0x33   :  { %618 = vmatpush3.bf16.xpose.msra.mxu1 %v231_v20  ;;  %613 = vmatprep.mubr.msk.bf16.mxu0 %vm786_vm0, %v785_v0 }
  0x34   :  { %619 = vmatprep.mubr.msk.bf16.mxu1 %vm786_vm0, %v785_v0  ;;  %623 = vmatprep.subr.bf16.mxu0 %v785_v0 }
  0x35   :  { %629 = vmatprep.subr.bf16.mxu1 %v785_v0 }
  0x39   :  { %614 = vmatmul.mubr.msk.bf16.vlgmr.msra.gmra.mxu0 %vm88_vm1, %v70_v23 }
  0x3a   :  { %620 = vmatmul.mubr.msk.bf16.vlgmr.msra.gmra.mxu1 %vm88_vm1, %v71_v24  ;;  %625 = vmatprep.mubr.msk.bf16.mxu0 %vm786_vm0, %v785_v0  ;;  %v86_v24 = vpack.c.bf16 %v82_v21, %v82_v21 }
  0x3b   :  { %631 = vmatprep.mubr.msk.bf16.mxu1 %vm786_vm0, %v785_v0  ;;  %624 = vmatpush3.bf16.msra.mxu0 %v353_v11 }
  0x3c   :  { %635 = vmatprep.subr.bf16.mxu0 %v785_v0  ;;  %630 = vmatpush3.bf16.msra.mxu1 %v399_v14 }
  0x3d   :  { %641 = vmatprep.subr.bf16.mxu1 %v785_v0 }
  0xf1   :  { %v129_v28 = vpop.f32.mrf.mxu0 }
  0xf2   :  { %v175_v29 = vpop.f32.mrf.mxu1  ;;  %v283_v30 = vsel %vm280_vm2, -1e+09, %v129_v28 }
  0xf3   :  { %v284_v31 = vsel %vm280_vm2, -1e+09, %v175_v29  ;;  %v603_v32 = vpop.f32.mrf.mxu0  ;;  %v288_v34 = vsel %vm287_vm3, %v283_v30, -inf }
  0xf4   :  { %v609_v33 = vpop.f32.mrf.mxu1  ;;  %289 = vmax.xlane.f32.xlu0 %v288_v34  ;;  %v291_v37 = vsel %vm287_vm3, %v284_v31, -inf }
  0xf5   :  { %v132_v35 = vpop.f32.mrf.mxu0 }
  0xf6   :  { %v178_v36 = vpop.f32.mrf.mxu1  ;;  %v87_v35 = vpack.c.bf16 %v83_v27, %v83_v27 }
  0xf7   :  { %v604_v38 = vpop.f32.mrf.mxu0 }
  0xf8   :  { %v610_v39 = vpop.f32.mrf.mxu1  ;;  %292 = vmax.xlane.f32.xlu0 %v291_v37 }
  0xf9   :  { %v221_v40 = vpop.f32.mrf.mxu0 }
  0xfa   :  { %v267_v41 = vpop.f32.mrf.mxu1  ;;  %v285_v42 = vsel %vm280_vm2, -1e+09, %v221_v40 }
  0xfb   :  { %v286_v43 = vsel %vm280_vm2, -1e+09, %v267_v41  ;;  %v615_v44 = vpop.f32.mrf.mxu0  ;;  %v294_v46 = vsel %vm287_vm3, %v285_v42, -inf }
  0xfc   :  { %v621_v45 = vpop.f32.mrf.mxu1  ;;  %295 = vmax.xlane.f32.xlu1 %v294_v46  ;;  %v297_v49 = vsel %vm287_vm3, %v286_v43, -inf }
  0xfd   :  { %v224_v47 = vpop.f32.mrf.mxu0 }
  0xfe   :  { %v270_v48 = vpop.f32.mrf.mxu1 }
  0xff   :  { %v616_v50 = vpop.f32.mrf.mxu0 }
 0x100   :  { %v622_v51 = vpop.f32.mrf.mxu1  ;;  %298 = vmax.xlane.f32.xlu1 %v297_v49 }
 0x17d   :  { %v290_v52 = vpop.xlane.xlu0 %289 }
 0x17e   :  { %v300_v53 = vsub.f32 %v283_v30, %v290_v52 }
 0x180   :  { %v304_v54 = vmul.f32 1.442695, %v300_v53 }
 0x181   :  { %v293_v55 = vpop.xlane.xlu0 %292 }
 0x182   :  { %656 = vpow2.f32 %v304_v54  ;;  %v301_v56 = vsub.f32 %v284_v31, %v293_v55  ;;  %v445_v31 = vsel %vm351_vm4, %v86_v24, 0 }
 0x184   :  { %v306_v57 = vmul.f32 1.442695, %v301_v56 }
 0x185   :  { %v296_v58 = vpop.xlane.xlu1 %295 }
 0x186   :  { %658 = vpow2.f32 %v306_v57  ;;  %v302_v59 = vsub.f32 %v285_v42, %v296_v58  ;;  %v491_v42 = vsel %vm351_vm4, %v87_v35, 0 }
 0x188   :  { %v308_v60 = vmul.f32 1.442695, %v302_v59 }
 0x189   :  { %v299_v61 = vpop.xlane.xlu1 %298 }
 0x18a   :  { %660 = vpow2.f32 %v308_v60  ;;  %v303_v62 = vsub.f32 %v286_v43, %v299_v61 }
 0x18c   :  { %v310_v63 = vmul.f32 1.442695, %v303_v62 }
 0x18e   :  { %662 = vpow2.f32 %v310_v63 }
 0x18f   :  { %v657_v1 = vpop.eup %656 }
 0x190   :  { %v312_v2 = vsel %vm287_vm3, %v657_v1, 0.0 }
 0x191   :  { %313 = vadd.xlane.f32.xlu0 %v312_v2 }
 0x193   :  { %v659_v3 = vpop.eup %658 }
 0x194   :  { %v315_v4 = vsel %vm287_vm3, %v659_v3, 0.0 }
 0x195   :  { %316 = vadd.xlane.f32.xlu1 %v315_v4 }
 0x197   :  { %v661_v5 = vpop.eup %660 }
 0x198   :  { %v318_v6 = vsel %vm287_vm3, %v661_v5, 0.0 }
 0x199   :  { %319 = vadd.xlane.f32.xlu0 %v318_v6 }
 0x19b   :  { %v663_v7 = vpop.eup %662 }
 0x19c   :  { %v321_v8 = vsel %vm287_vm3, %v663_v7, 0.0 }
 0x19d   :  { %322 = vadd.xlane.f32.xlu1 %v321_v8 }
 0x21a   :  { %v314_v15 = vpop.xlane.xlu0 %313 }
 0x21b   :  { %664 = vrcp.f32 %v314_v15 }
 0x21e   :  { %v317_v16 = vpop.xlane.xlu1 %316 }
 0x21f   :  { %666 = vrcp.f32 %v317_v16 }
 0x222   :  { %v320_v17 = vpop.xlane.xlu0 %319 }
 0x223   :  { %668 = vrcp.f32 %v320_v17 }
 0x226   :  { %v323_v18 = vpop.xlane.xlu1 %322 }
 0x227   :  { %670 = vrcp.f32 %v323_v18 }
 0x228   :  { %v665_v19 = vpop.eup %664 }
 0x229   :  { %v328_v20 = vmul.f32 %v665_v19, %v314_v15 }
 0x22b   :  { %v332_v22 = vsub.f32 2.0, %v328_v20 }
 0x22c   :  { %v667_v23 = vpop.eup %666 }
 0x22d   :  { %v336_v25 = vmul.f32 %v665_v19, %v332_v22  ;;  %v329_v26 = vmul.f32 %v667_v23, %v317_v16 }
 0x22f   :  { %v340_v28 = vmul.f32 %v657_v1, %v336_v25  ;;  %v333_v29 = vsub.f32 2.0, %v329_v26 }
 0x230   :  { %v669_v30 = vpop.eup %668 }
 0x231   :  { %v344_v32 = vpack.c.bf16 %v340_v28, %v340_v28  ;;  %537 = vst.msk [vmem:[#allocation9] sm:$0xff] %vm287_vm3, %v340_v28  ;;  %v337_v33 = vmul.f32 %v667_v23, %v333_v29  ;;  %v330_v34 = vmul.f32 %v669_v30, %v320_v17 }
 0x233   :  { %v341_v36 = vmul.f32 %v659_v3, %v337_v33  ;;  %v334_v37 = vsub.f32 2.0, %v330_v34  ;;  %626 = vmatmul.mubr.msk.bf16.vlgmr.msra.gmra.mxu0 %vm287_vm3, %v344_v32 }
 0x234   :  { %v671_v38 = vpop.eup %670  ;;  %636 = vmatpush3.bf16.msra.mxu0 %v445_v31  ;;  %637 = vmatprep.mubr.msk.bf16.mxu0 %vm786_vm0, %v785_v0 }
 0x235   :  { %v345_v39 = vpack.c.bf16 %v341_v36, %v341_v36  ;;  %538 = vst.msk [vmem:[#allocation9 + $0x8] sm:$0xff] %vm287_vm3, %v341_v36  ;;  %v338_v40 = vmul.f32 %v669_v30, %v334_v37  ;;  %v331_v41 = vmul.f32 %v671_v38, %v323_v18 }
 0x237   :  { %v342_v43 = vmul.f32 %v661_v5, %v338_v40  ;;  %v335_v44 = vsub.f32 2.0, %v331_v41  ;;  %632 = vmatmul.mubr.msk.bf16.vlgmr.msra.gmra.mxu1 %vm287_vm3, %v345_v39 }
 0x238   :  { %642 = vmatpush3.bf16.msra.mxu1 %v491_v42  ;;  %643 = vmatprep.mubr.msk.bf16.mxu1 %vm786_vm0, %v785_v0 }
 0x239   :  { %v346_v45 = vpack.c.bf16 %v342_v43, %v342_v43  ;;  %539 = vst.msk [vmem:[#allocation9 + $0x10] sm:$0xff] %vm287_vm3, %v342_v43  ;;  %v339_v46 = vmul.f32 %v671_v38, %v335_v44 }
 0x23b   :  { %v343_v47 = vmul.f32 %v663_v7, %v339_v46  ;;  %638 = vmatmul.mubr.msk.bf16.vlgmr.msra.gmra.mxu0 %vm287_vm3, %v346_v45 }
 0x23d   :  { %v347_v48 = vpack.c.bf16 %v343_v47, %v343_v47  ;;  %540 = vst.msk [vmem:[#allocation9 + $0x18] sm:$0xff] %vm287_vm3, %v343_v47 }
 0x23f   :  { %644 = vmatmul.mubr.msk.bf16.vlgmr.msra.gmra.mxu1 %vm287_vm3, %v347_v48 }
 0x240   :  { %743 = shalt.err (!%p740_p5)
}
 0x241   :  { %564 = dma.vmem_to_hbm [thread:$0]  %s559_s2, 512, %s908_s4, [#allocation10], %s782_s20, %s782_s20, %s783_s21  }
 0x242   :  { %s788_s8 = smov [#allocation8]  }
 0x243   :  { %s546_s9 = sshll.u32 %s788_s8, 4  ;;  %s547_s9 = int_to_ptr.vmem [resolvable:$true] %s546_s9 }
 0x244   :  { %s752_s4 = scalar_lea.vmem %s547_s9, 512  ;;  %p757_p7 = scmp.lt.s32.totalorder %s547_s9, %s547_s9 }
 0x245   :  { %p753_p6 = scmp.ne.s32.totalorder %s547_s9, %s752_s4  ;;  %p758_p8 = scmp.lt.s32.totalorder %s752_s4, %s752_s4 }
 0x247   :  { %p759_p9 = por %p758_p8, %p757_p7 }
 0x249   :  { %p760_p10 = pnand %p759_p9, %p753_p6 }
 0x2f3   :  { %v389_v0 = vpop.f32.mrf.mxu0 }
 0x2f4   :  { %533 = vst.msk [vmem:[#allocation8] sm:$0xff] %vm88_vm1, %v389_v0 }
 0x2f5   :  { %v627_v49 = vpop.f32.mrf.mxu0 }
 0x2f7   :  { %v392_v50 = vpop.f32.mrf.mxu0  ;;  %v435_v51 = vpop.f32.mrf.mxu1 }
 0x2f8   :  { %534 = vst.msk [vmem:[#allocation8 + $0x8] sm:$0xff] %vm88_vm1, %v435_v51 }
 0x2f9   :  { %v628_v52 = vpop.f32.mrf.mxu0  ;;  %v633_v53 = vpop.f32.mrf.mxu1 }
 0x2fb   :  { %v438_v54 = vpop.f32.mrf.mxu1  ;;  %v481_v55 = vpop.f32.mrf.mxu0 }
 0x2fc   :  { %535 = vst.msk [vmem:[#allocation8 + $0x10] sm:$0xff] %vm88_vm1, %v481_v55 }
 0x2fd   :  { %v634_v56 = vpop.f32.mrf.mxu1  ;;  %v639_v57 = vpop.f32.mrf.mxu0 }
 0x2ff   :  { %v484_v58 = vpop.f32.mrf.mxu0  ;;  %v527_v59 = vpop.f32.mrf.mxu1 }
 0x300   :  { %536 = vst.msk [vmem:[#allocation8 + $0x18] sm:$0xff] %vm88_vm1, %v527_v59 }
 0x301   :  { %v640_v60 = vpop.f32.mrf.mxu0  ;;  %v645_v61 = vpop.f32.mrf.mxu1 }
 0x302   :  { %763 = shalt.err (!%p760_p10)
}
 0x303   :  { %552 = dma.vmem_to_hbm [thread:$0]  %s547_s9, 512, %s907_s3, [#allocation4], %s782_s20, %s782_s20, %s783_s21   ;;  %v530_v62 = vpop.f32.mrf.mxu1 }
 0x305   :  { %v646_v63 = vpop.f32.mrf.mxu1 }
 0x306   :  { %776 = dma.done.wait [#allocation4], 512  }
 0x307   :  { %777 = vsyncadd [#allocation4], 4294966784 }
 0x308   :  { %778 = dma.done.wait [#allocation10], 512  }
 0x309   :  { %779 = vsyncadd [#allocation10], 4294966784 }
 0x30a   :  { %571 = vsyncpa [#allocation3], 1 }
 0x30b   :  { %572 = vsyncpa [#allocation6], 1 }
 0x30c   :  { %573 = vsyncpa [#allocation4], 1 }
 0x30d   :  { %574 = vsyncpa [#allocation10], 1 }

</bundles_post_ra>
